<compile_context>
chip_gen: v6e
topology: v6e:2x2x1
jax: 0.10.0
libtpu: 0.0.40
codegen_flags: <defaults>
</compile_context>

<pallas_src>
import jax
import jax.numpy as jnp
from jax.experimental import pallas as pl
from jax.experimental.pallas import tpu as pltpu

# ---------------- model hyper-parameters (consistent with the module) ----------------
B = 8            # batch
DB = 16          # bio_input_dim
DC = 12          # clinical_input_dim
H1, H2 = 32, 16  # hidden_dims
F = 32           # fusion_dim
C = 4            # num_classes
EPS = 1e-5

LANES = 128
N_BLOCKS = 7                 # seven 128x128 weight blocks
RB = N_BLOCKS * LANES        # row offset of the 8-row bias block (896)
WB_ROWS = RB + 8             # 904

# weight-block indices (each block = rows [i*128 : (i+1)*128] of the slab)
BLK_ENC1, BLK_ENC2, BLK_ENC3, BLK_IMP, BLK_ATTN, BLK_CLF1, BLK_CLF2 = range(7)
# bias-row indices (rows RB .. RB+7 of the slab)
BR_ENC1, BR_ENC2, BR_ENC3, BR_IMP, BR_ATTN, BR_CLF1, BR_CLF2, BR_ALPHA = range(8)


# ---------------------------------- kernel --------------------------------------
def _mm_kernel(data_ref, wb_ref, out_ref):
    def wblk(i):
        return wb_ref[i * LANES:(i + 1) * LANES, :]            # [128,128]

    def bias(r):
        return wb_ref[RB + r:RB + r + 1, :]                     # [1,128]

    def dot(x, i):
        return jnp.dot(x, wblk(i), preferred_element_type=jnp.float32)

    x = data_ref[0:B, :]                                        # [8,128] bio|clin|0
    sel = data_ref[B:2 * B, :]                                  # [8,128] pre-broadcast select

    # ---- fused bio|clin encoders (block-diagonal weights, eval-BN pre-folded) ----
    z = jnp.maximum(dot(x, BLK_ENC1) + bias(BR_ENC1), 0.0)
    z = jnp.maximum(dot(z, BLK_ENC2) + bias(BR_ENC2), 0.0)
    feat = dot(z, BLK_ENC3) + bias(BR_ENC3)                     # [8,128] = [bio_f|clin_f|0]

    # ---- imputation candidates [clinical->bio | bio->clinical] in one dot ----
    cand = dot(feat, BLK_IMP) + bias(BR_IMP)                    # [8,128]
    imp = feat + sel * (cand - feat)                            # lane-parallel select

    # ---- gate: alpha*orig + (1-alpha)*imputed (alpha pre-sigmoided, lane-replicated) ----
    a = bias(BR_ALPHA)                                          # [1,128], all lanes = sigmoid(alpha)
    fused = imp + a * (feat - imp)

    # ---- attention fusion over the 2 modalities (all-ones availability mask) ----
    # score dot yields lanes [s0*F | s1*F | s1*F | s0*F]; roll by 64 pairs self/other per lane
    scores = dot(fused, BLK_ATTN) + bias(BR_ATTN)               # [8,128]
    other = pltpu.roll(scores, shift=2 * F, axis=1)             # [s1|s0|s0|s1]
    m = jnp.maximum(scores, other)
    e_self = jnp.exp(scores - m)
    e_other = jnp.exp(other - m)
    attn_w = e_self * pl.reciprocal(e_self + e_other, approx=True)
    weighted = fused * attn_w                                   # [w0*bio | w1*clin | 0 | 0]

    # ---- classifier: Linear -> (folded BN) -> ReLU -> (Dropout=id) -> Linear ----
    # the bio+clin weighted sum is folded into BLK_CLF1 (cw1 stacked on rows 0:F and F:2F)
    h = jnp.maximum(dot(weighted, BLK_CLF1) + bias(BR_CLF1), 0.0)
    logits = dot(h, BLK_CLF2) + bias(BR_CLF2)                   # lanes 0:C = logits, rest 0

    # ---- single lane-dense output slab: full 128-lane stores only ----
    out_ref[0:B, :] = feat
    out_ref[B:2 * B, :] = imp
    out_ref[2 * B:3 * B, :] = logits


# ---------------------------------- wrapper --------------------------------------
def forward(packed, bio_data, clinical_data, modality_mask):
    m0 = modality_mask[:, 0:1]
    m1 = modality_mask[:, 1:2]
    sel_bio = ((m0 == 0.0) & (m1 == 1.0)).astype(jnp.float32)    # bio missing, clin present
    sel_clin = ((m0 == 1.0) & (m1 == 0.0)).astype(jnp.float32)   # clin missing, bio present

    x_row = jnp.concatenate(
        [bio_data, clinical_data, jnp.zeros((B, LANES - DB - DC), jnp.float32)], axis=1)
    sel_row = jnp.concatenate(
        [jnp.broadcast_to(sel_bio, (B, F)),
         jnp.broadcast_to(sel_clin, (B, F)),
         jnp.zeros((B, LANES - 2 * F), jnp.float32)], axis=1)
    data = jnp.concatenate([x_row, sel_row], axis=0)             # [2B, 128]

    vmem = pl.BlockSpec(memory_space=pltpu.MemorySpace.VMEM)
    out = pl.pallas_call(
        _mm_kernel,
        out_shape=jax.ShapeDtypeStruct((3 * B, LANES), jnp.float32),
        in_specs=[vmem, vmem],
        out_specs=vmem,
        compiler_params=pltpu.CompilerParams(allow_input_fusion=[True, False]),
        cost_estimate=pl.CostEstimate(
            flops=2 * N_BLOCKS * B * LANES * LANES,
            transcendentals=3 * B * LANES,
            bytes_accessed=4 * (WB_ROWS * LANES + 2 * B * LANES + 3 * B * LANES)),
    )(data, packed["wb"])

    modality_features = out[0:B, 0:2 * F].reshape(B, 2, F)
    imputed_features = out[B:2 * B, 0:2 * F].reshape(B, 2, F)
    logits = out[2 * B:3 * B, 0:C]
    return logits, modality_features, imputed_features


# ------------------------- deterministic parameter init --------------------------
def _init_params(key):
    def linear(key, din, dout):
        k1, k2 = jax.random.split(key)
        bound = 1.0 / jnp.sqrt(jnp.float32(din))
        w = jax.random.uniform(k1, (din, dout), jnp.float32, -bound, bound)
        b = jax.random.uniform(k2, (1, dout), jnp.float32, -bound, bound)
        return w, b

    def bn(key, dim):
        # eval-mode BatchNorm expressed as scale/shift
        k1, k2, k3, k4 = jax.random.split(key, 4)
        gamma = jax.random.uniform(k1, (1, dim), jnp.float32, 0.5, 1.5)
        beta = 0.1 * jax.random.normal(k2, (1, dim), jnp.float32)
        rmean = 0.1 * jax.random.normal(k3, (1, dim), jnp.float32)
        rvar = jax.random.uniform(k4, (1, dim), jnp.float32, 0.5, 1.5)
        scale = gamma / jnp.sqrt(rvar + EPS)
        shift = beta - rmean * scale
        return scale, shift

    def encoder(key, din):
        k = jax.random.split(key, 5)
        w1, b1 = linear(k[0], din, H1)
        s1, h1 = bn(k[1], H1)
        w2, b2 = linear(k[2], H1, H2)
        s2, h2 = bn(k[3], H2)
        w3, b3 = linear(k[4], H2, F)
        return [w1, b1, s1, h1, w2, b2, s2, h2, w3, b3]

    keys = jax.random.split(key, 7)
    params = {"alpha": jnp.full((1, 1), 0.5, jnp.float32)}
    params["bio_enc"] = encoder(keys[0], DB)
    params["clin_enc"] = encoder(keys[1], DC)
    aw0, ab0 = linear(keys[2], F, 1)
    aw1, ab1 = linear(keys[3], F, 1)
    params["attn"] = [aw0, ab0, aw1, ab1]              # aw*: [F,1], ab*: [1,1]
    wc2b, bc2b = linear(keys[4], F, F)                 # clinical -> bio
    wb2c, bb2c = linear(keys[5], F, F)                 # bio -> clinical
    params["imput"] = [wc2b, bc2b, wb2c, bb2c]
    kc = jax.random.split(keys[6], 3)
    cw1, cb1 = linear(kc[0], F, H2)
    cs1, ch1 = bn(kc[1], H2)
    cw2, cb2 = linear(kc[2], H2, C)
    params["clf"] = [cw1, cb1, cs1, ch1, cw2, cb2]
    return params


# ----------------- parameter folding & slab packing (done once, host/XLA side) ----
def _fold_bn(w, b, scale, shift):
    # Linear then eval-mode BN:  y = (xW + b)*scale + shift = x(W*scale) + (b*scale+shift)
    return w * scale, b * scale + shift


def _pack_params(params):
    bw1, bb1, bs1, bh1, bw2, bb2, bs2, bh2, bw3, bb3 = params["bio_enc"]
    qw1, qb1, qs1, qh1, qw2, qb2, qs2, qh2, qw3, qb3 = params["clin_enc"]
    aw0, ab0, aw1, ab1 = params["attn"]
    wc2b, bc2b, wb2c, bb2c = params["imput"]
    cw1, cb1, cs1, ch1, cw2, cb2 = params["clf"]

    bw1f, bb1f = _fold_bn(bw1, bb1, bs1, bh1)
    bw2f, bb2f = _fold_bn(bw2, bb2, bs2, bh2)
    qw1f, qb1f = _fold_bn(qw1, qb1, qs1, qh1)
    qw2f, qb2f = _fold_bn(qw2, qb2, qs2, qh2)
    cw1f, cb1f = _fold_bn(cw1, cb1, cs1, ch1)

    def block():
        return jnp.zeros((LANES, LANES), jnp.float32)

    # full 128x128 zero-padded blocks — every kernel dot is [8,128] x [128,128]
    W1 = block().at[0:DB, 0:H1].set(bw1f).at[DB:DB + DC, H1:2 * H1].set(qw1f)
    W2 = block().at[0:H1, 0:H2].set(bw2f).at[H1:2 * H1, H2:2 * H2].set(qw2f)
    W3 = block().at[0:H2, 0:F].set(bw3).at[H2:2 * H2, F:2 * F].set(qw3)
    # imputation: cand[:, :F] = clin_f @ wc2b , cand[:, F:2F] = bio_f @ wb2c
    WI = block().at[F:2 * F, 0:F].set(wc2b).at[0:F, F:2 * F].set(wb2c)
    # attention scores replicated per lane: columns carry [s0*F | s1*F | s1*F | s0*F]
    aw0r = jnp.broadcast_to(aw0, (F, F))
    aw1r = jnp.broadcast_to(aw1, (F, F))
    WA = (block().at[0:F, 0:F].set(aw0r).at[F:2 * F, F:2 * F].set(aw1r)
                 .at[F:2 * F, 2 * F:3 * F].set(aw1r).at[0:F, 3 * F:4 * F].set(aw0r))
    # classifier layer 1 with the bio+clin weighted sum folded in (cw1 stacked twice)
    C1 = block().at[0:F, 0:H2].set(cw1f).at[F:2 * F, 0:H2].set(cw1f)
    C2 = block().at[0:H2, 0:C].set(cw2)

    def brow(*pieces):
        row = jnp.concatenate([p.reshape(1, -1) for p in pieces], axis=1)
        return jnp.pad(row, ((0, 0), (0, LANES - row.shape[1])))

    alpha_sig = jax.nn.sigmoid(params["alpha"]).reshape(1, 1)
    b_rows = jnp.concatenate([
        brow(bb1f, qb1f),                                        # BR_ENC1
        brow(bb2f, qb2f),                                        # BR_ENC2
        brow(bb3, qb3),                                          # BR_ENC3
        brow(bc2b, bb2c),                                        # BR_IMP
        brow(jnp.broadcast_to(ab0, (1, F)), jnp.broadcast_to(ab1, (1, F)),
             jnp.broadcast_to(ab1, (1, F)), jnp.broadcast_to(ab0, (1, F))),  # BR_ATTN
        brow(cb1f),                                              # BR_CLF1
        brow(cb2),                                               # BR_CLF2
        jnp.broadcast_to(alpha_sig, (1, LANES)),                 # BR_ALPHA (lane-replicated)
    ], axis=0)

    wb = jnp.concatenate([W1, W2, W3, WI, WA, C1, C2, b_rows], axis=0)
    assert wb.shape == (WB_ROWS, LANES)
    return {"wb": wb}


if __name__ == "__main__":
    root = jax.random.PRNGKey(0)
    kp, kb, kc = jax.random.split(root, 3)

    params = _init_params(kp)
    packed = _pack_params(params)

    bio_data = jax.random.normal(kb, (B, DB), jnp.float32)
    clinical_data = jax.random.normal(kc, (B, DC), jnp.float32)
    # deterministic availability mask: both-present / bio-missing / clin-missing / both-missing
    modality_mask = jnp.array(
        [[1, 1], [0, 1], [1, 0], [1, 1], [0, 1], [1, 0], [1, 1], [0, 0]],
        dtype=jnp.float32,
    )

    logits, modality_features, imputed_features = jax.jit(forward)(
        packed, bio_data, clinical_data, modality_mask
    )
    jax.block_until_ready((logits, modality_features, imputed_features))

    assert logits.shape == (B, C)
    assert modality_features.shape == (B, 2, F)
    assert imputed_features.shape == (B, 2, F)
    print("KERNEL_OK")
</pallas_src>

<mosaic_0001>
module attributes {stable_mosaic.version = 11 : i64} {
  func.func @_mm_kernel(%arg0: memref<16x128xf32, #tpu.memory_space<vmem>>, %arg1: memref<904x128xf32, #tpu.memory_space<vmem>>, %arg2: memref<24x128xf32, #tpu.memory_space<vmem>>) attributes {dimension_semantics = [], scalar_prefetch = 0 : i64, scratch_operands = 0 : i64, tpu.core_type = #tpu.core_type<tc>} {
    %c0 = arith.constant 0 : index
    %c0_0 = arith.constant 0 : index
    %0 = vector.load %arg0[%c0, %c0_0] : memref<16x128xf32, #tpu.memory_space<vmem>>, vector<8x128xf32>
    %c8 = arith.constant 8 : index
    %c0_1 = arith.constant 0 : index
    %1 = vector.load %arg0[%c8, %c0_1] : memref<16x128xf32, #tpu.memory_space<vmem>>, vector<8x128xf32>
    %c0_2 = arith.constant 0 : index
    %c0_3 = arith.constant 0 : index
    %2 = vector.load %arg1[%c0_2, %c0_3] : memref<904x128xf32, #tpu.memory_space<vmem>>, vector<128x128xf32>
    %cst = arith.constant dense<0.000000e+00> : vector<8x128xf32>
    %3 = tpu.matmul %0, %2, %cst {dimension_numbers = #tpu.dot_dimension_numbers<[1], [0], [0], [1], [0, 0, 1, 1], [], []>} : vector<8x128xf32>, vector<128x128xf32>, vector<8x128xf32> -> vector<8x128xf32>
    %c896 = arith.constant 896 : index
    %c0_4 = arith.constant 0 : index
    %4 = vector.load %arg1[%c896, %c0_4] : memref<904x128xf32, #tpu.memory_space<vmem>>, vector<1x128xf32>
    %5 = vector.broadcast %4 : vector<1x128xf32> to vector<8x128xf32>
    %6 = arith.addf %3, %5 : vector<8x128xf32>
    %cst_5 = arith.constant 0.000000e+00 : f32
    %7 = vector.broadcast %cst_5 : f32 to vector<8x128xf32>
    %8 = arith.maximumf %6, %7 : vector<8x128xf32>
    %c128 = arith.constant 128 : index
    %c0_6 = arith.constant 0 : index
    %9 = vector.load %arg1[%c128, %c0_6] : memref<904x128xf32, #tpu.memory_space<vmem>>, vector<128x128xf32>
    %cst_7 = arith.constant dense<0.000000e+00> : vector<8x128xf32>
    %10 = tpu.matmul %8, %9, %cst_7 {dimension_numbers = #tpu.dot_dimension_numbers<[1], [0], [0], [1], [0, 0, 1, 1], [], []>} : vector<8x128xf32>, vector<128x128xf32>, vector<8x128xf32> -> vector<8x128xf32>
    %c897 = arith.constant 897 : index
    %c0_8 = arith.constant 0 : index
    %11 = vector.load %arg1[%c897, %c0_8] : memref<904x128xf32, #tpu.memory_space<vmem>>, vector<1x128xf32>
    %12 = vector.broadcast %11 : vector<1x128xf32> to vector<8x128xf32>
    %13 = arith.addf %10, %12 : vector<8x128xf32>
    %cst_9 = arith.constant 0.000000e+00 : f32
    %14 = vector.broadcast %cst_9 : f32 to vector<8x128xf32>
    %15 = arith.maximumf %13, %14 : vector<8x128xf32>
    %c256 = arith.constant 256 : index
    %c0_10 = arith.constant 0 : index
    %16 = vector.load %arg1[%c256, %c0_10] : memref<904x128xf32, #tpu.memory_space<vmem>>, vector<128x128xf32>
    %cst_11 = arith.constant dense<0.000000e+00> : vector<8x128xf32>
    %17 = tpu.matmul %15, %16, %cst_11 {dimension_numbers = #tpu.dot_dimension_numbers<[1], [0], [0], [1], [0, 0, 1, 1], [], []>} : vector<8x128xf32>, vector<128x128xf32>, vector<8x128xf32> -> vector<8x128xf32>
    %c898 = arith.constant 898 : index
    %c0_12 = arith.constant 0 : index
    %18 = vector.load %arg1[%c898, %c0_12] : memref<904x128xf32, #tpu.memory_space<vmem>>, vector<1x128xf32>
    %19 = vector.broadcast %18 : vector<1x128xf32> to vector<8x128xf32>
    %20 = arith.addf %17, %19 : vector<8x128xf32>
    %c384 = arith.constant 384 : index
    %c0_13 = arith.constant 0 : index
    %21 = vector.load %arg1[%c384, %c0_13] : memref<904x128xf32, #tpu.memory_space<vmem>>, vector<128x128xf32>
    %cst_14 = arith.constant dense<0.000000e+00> : vector<8x128xf32>
    %22 = tpu.matmul %20, %21, %cst_14 {dimension_numbers = #tpu.dot_dimension_numbers<[1], [0], [0], [1], [0, 0, 1, 1], [], []>} : vector<8x128xf32>, vector<128x128xf32>, vector<8x128xf32> -> vector<8x128xf32>
    %c899 = arith.constant 899 : index
    %c0_15 = arith.constant 0 : index
    %23 = vector.load %arg1[%c899, %c0_15] : memref<904x128xf32, #tpu.memory_space<vmem>>, vector<1x128xf32>
    %24 = vector.broadcast %23 : vector<1x128xf32> to vector<8x128xf32>
    %25 = arith.addf %22, %24 : vector<8x128xf32>
    %26 = arith.subf %25, %20 : vector<8x128xf32>
    %27 = arith.mulf %1, %26 : vector<8x128xf32>
    %28 = arith.addf %20, %27 : vector<8x128xf32>
    %c903 = arith.constant 903 : index
    %c0_16 = arith.constant 0 : index
    %29 = vector.load %arg1[%c903, %c0_16] : memref<904x128xf32, #tpu.memory_space<vmem>>, vector<1x128xf32>
    %30 = arith.subf %20, %28 : vector<8x128xf32>
    %31 = vector.broadcast %29 : vector<1x128xf32> to vector<8x128xf32>
    %32 = arith.mulf %31, %30 : vector<8x128xf32>
    %33 = arith.addf %28, %32 : vector<8x128xf32>
    %c512 = arith.constant 512 : index
    %c0_17 = arith.constant 0 : index
    %34 = vector.load %arg1[%c512, %c0_17] : memref<904x128xf32, #tpu.memory_space<vmem>>, vector<128x128xf32>
    %cst_18 = arith.constant dense<0.000000e+00> : vector<8x128xf32>
    %35 = tpu.matmul %33, %34, %cst_18 {dimension_numbers = #tpu.dot_dimension_numbers<[1], [0], [0], [1], [0, 0, 1, 1], [], []>} : vector<8x128xf32>, vector<128x128xf32>, vector<8x128xf32> -> vector<8x128xf32>
    %c900 = arith.constant 900 : index
    %c0_19 = arith.constant 0 : index
    %36 = vector.load %arg1[%c900, %c0_19] : memref<904x128xf32, #tpu.memory_space<vmem>>, vector<1x128xf32>
    %37 = vector.broadcast %36 : vector<1x128xf32> to vector<8x128xf32>
    %38 = arith.addf %35, %37 : vector<8x128xf32>
    %c64_i32 = arith.constant 64 : i32
    %39 = tpu.dynamic_rotate %38 by %c64_i32 dim 1 : vector<8x128xf32>, i32 -> vector<8x128xf32>
    %40 = arith.maximumf %38, %39 : vector<8x128xf32>
    %41 = arith.subf %38, %40 : vector<8x128xf32>
    %42 = math.exp %41 : vector<8x128xf32>
    %43 = arith.subf %39, %40 : vector<8x128xf32>
    %44 = math.exp %43 : vector<8x128xf32>
    %45 = arith.addf %42, %44 : vector<8x128xf32>
    %46 = tpu.reciprocal %45 {approx = true} : vector<8x128xf32> -> vector<8x128xf32>
    %47 = arith.mulf %42, %46 : vector<8x128xf32>
    %48 = arith.mulf %33, %47 : vector<8x128xf32>
    %c640 = arith.constant 640 : index
    %c0_20 = arith.constant 0 : index
    %49 = vector.load %arg1[%c640, %c0_20] : memref<904x128xf32, #tpu.memory_space<vmem>>, vector<128x128xf32>
    %cst_21 = arith.constant dense<0.000000e+00> : vector<8x128xf32>
    %50 = tpu.matmul %48, %49, %cst_21 {dimension_numbers = #tpu.dot_dimension_numbers<[1], [0], [0], [1], [0, 0, 1, 1], [], []>} : vector<8x128xf32>, vector<128x128xf32>, vector<8x128xf32> -> vector<8x128xf32>
    %c901 = arith.constant 901 : index
    %c0_22 = arith.constant 0 : index
    %51 = vector.load %arg1[%c901, %c0_22] : memref<904x128xf32, #tpu.memory_space<vmem>>, vector<1x128xf32>
    %52 = vector.broadcast %51 : vector<1x128xf32> to vector<8x128xf32>
    %53 = arith.addf %50, %52 : vector<8x128xf32>
    %cst_23 = arith.constant 0.000000e+00 : f32
    %54 = vector.broadcast %cst_23 : f32 to vector<8x128xf32>
    %55 = arith.maximumf %53, %54 : vector<8x128xf32>
    %c768 = arith.constant 768 : index
    %c0_24 = arith.constant 0 : index
    %56 = vector.load %arg1[%c768, %c0_24] : memref<904x128xf32, #tpu.memory_space<vmem>>, vector<128x128xf32>
    %cst_25 = arith.constant dense<0.000000e+00> : vector<8x128xf32>
    %57 = tpu.matmul %55, %56, %cst_25 {dimension_numbers = #tpu.dot_dimension_numbers<[1], [0], [0], [1], [0, 0, 1, 1], [], []>} : vector<8x128xf32>, vector<128x128xf32>, vector<8x128xf32> -> vector<8x128xf32>
    %c902 = arith.constant 902 : index
    %c0_26 = arith.constant 0 : index
    %58 = vector.load %arg1[%c902, %c0_26] : memref<904x128xf32, #tpu.memory_space<vmem>>, vector<1x128xf32>
    %59 = vector.broadcast %58 : vector<1x128xf32> to vector<8x128xf32>
    %60 = arith.addf %57, %59 : vector<8x128xf32>
    %c0_27 = arith.constant 0 : index
    %c0_28 = arith.constant 0 : index
    %61 = vector.load %arg2[%c0_27, %c0_28] : memref<24x128xf32, #tpu.memory_space<vmem>>, vector<8x128xf32>
    tpu.vector_store %arg2[%c0_27, %c0_28], %20 {strides = array<i32>} : memref<24x128xf32, #tpu.memory_space<vmem>>, vector<8x128xf32>,
    %c8_29 = arith.constant 8 : index
    %c0_30 = arith.constant 0 : index
    %62 = vector.load %arg2[%c8_29, %c0_30] : memref<24x128xf32, #tpu.memory_space<vmem>>, vector<8x128xf32>
    tpu.vector_store %arg2[%c8_29, %c0_30], %28 {strides = array<i32>} : memref<24x128xf32, #tpu.memory_space<vmem>>, vector<8x128xf32>,
    %c16 = arith.constant 16 : index
    %c0_31 = arith.constant 0 : index
    %63 = vector.load %arg2[%c16, %c0_31] : memref<24x128xf32, #tpu.memory_space<vmem>>, vector<8x128xf32>
    tpu.vector_store %arg2[%c16, %c0_31], %60 {strides = array<i32>} : memref<24x128xf32, #tpu.memory_space<vmem>>, vector<8x128xf32>,
    return
  }
}

</mosaic_0001>

<bundles_post_ra>
// kernel: forward.2
= control target key start
LH: loop header
LB: loop body
LE: loop exit
PB: predicated region body
PF: predicated region fallthrough
CT: control target
= control target key end

     0   :  { %s1728_s0 = inlined_call_operand.hbm [shape: f32[904,128], index: 0, kind: input, shape index: {}]   ;;  %s1729_s1 = inlined_call_operand.vmem [shape: f32[8,64], index: 1, kind: input, shape index: {}]   ;;  %s1730_s2 = inlined_call_operand.<no memory space> [shape: f32[], index: 2, kind: input, shape index: {}]   ;;  %s1731_s3 = inlined_call_operand.vmem [shape: f32[8,32], index: 3, kind: input, shape index: {}]   ;;  %s1732_s4 = inlined_call_operand.vmem [shape: f32[8,32], index: 4, kind: input, shape index: {}]   ;;  %s1733_s5 = inlined_call_operand.vmem [shape: f32[8,100], index: 5, kind: input, shape index: {}]   ;;  %s1734_s6 = inlined_call_operand.vmem [shape: f32[8,12], index: 6, kind: input, shape index: {}]   ;;  %s1735_s7 = inlined_call_operand.vmem [shape: f32[8,16], index: 7, kind: input, shape index: {}]   ;;  %s1736_s8 = inlined_call_operand.vmem [shape: f32[24,128], index: 8, kind: output, shape index: {}]  }
   0x1   :  { %v1532_v0 = vstv %s1730_s2 }
   0x2   :  { %19 = vsyncpa [#allocation33], 0  ;;  %s1475_s29 = smov [#allocation32]  }
   0x3   :  { %s105_s30 = sshll.u32 %s1475_s29, 4  ;;  %s106_s30 = int_to_ptr.vmem [resolvable:$true] %s105_s30 }
   0x4   :  { %s1461_s9 = scalar_lea.vmem %s106_s30, 14464  ;;  %p1466_p1 = scmp.lt.s32.totalorder %s106_s30, %s106_s30 }
   0x5   :  { %p1462_p0 = scmp.ne.s32.totalorder %s106_s30, %s1461_s9  ;;  %p1467_p2 = scmp.lt.s32.totalorder %s1461_s9, %s1461_s9 }
   0x7   :  { %p1468_p3 = por %p1467_p2, %p1466_p1 }
   0x9   :  { %p1469_p4 = pnand %p1468_p3, %p1462_p0 }
   0xb   :  { %1472 = shalt.err (!%p1469_p4)
}
   0xc   :  { %s1476_s10 = smov 128   ;;  %s1477_s11 = smov 8  }
   0xd   :  { %111 = dma.hbm_to_vmem [thread:$0]  %s1728_s0, 14464, %s106_s30, [#allocation33], %s1476_s10, %s1476_s10, %s1477_s11  }
   0xe   :  { %1473 = dma.done.wait [#allocation33], 14464  }
   0xf   :  { %1474 = vsyncadd [#allocation33], 4294952832  ;;  %v250_v1 = vlaneseq  ;;  %v1478_v2 = vmov 0.0   ;;  %vm1479_vm0 = vmmov 0   ;;  %v264_v5 = vld [vmem:[%s1734_s6] sm:$0xff]  ;;  %v373_v7 = vld [vmem:[#allocation32 + $0x78] sm:$0xff] }
  0x10   :  { %1193 = vmatprep.subr.mxu0 %v1478_v2  ;;  %1228 = vmatprep.subr.mxu1 %v1478_v2  ;;  %v249_v6 = vld [vmem:[%s1733_s5] sm:$0xff]  ;;  %v372_v10 = vld [vmem:[#allocation32 + $0x70] sm:$0xff]  ;;  %v371_v12 = vld [vmem:[#allocation32 + $0x68] sm:$0xff]  ;;  %s1480_s16 = smov 16   ;;  %s1481_s5 = smov 28  }
  0x11   :  { %v1539_v3 = vand.u32 127, %v250_v1  ;;  %1225 = vmatprep.mubr.msk.f32.mxu0 %vm1479_vm0, %v1478_v2  ;;  %1260 = vmatprep.mubr.msk.f32.mxu1 %vm1479_vm0, %v1478_v2  ;;  %v370_v14 = vld [vmem:[#allocation32 + $0x60] sm:$0xff]  ;;  %v369_v15 = vld [vmem:[#allocation32 + $0x58] sm:$0xff]  ;;  %v464_v17 = vld [vmem:[#allocation32 + $0xf0] sm:$0xff] }
  0x12   :  { %1194 = vmatpush3.msra.mxu0 %v373_v7  ;;  %v465_v16 = vld [vmem:[#allocation32 + $0xf8] sm:$0xff]  ;;  %v368_v18 = vld [vmem:[#allocation32 + $0x50] sm:$0xff]  ;;  %v463_v19 = vld [vmem:[#allocation32 + $0xe8] sm:$0xff] }
  0x13   :  { %v1542_v4 = vadd.s32 128, %v1539_v3  ;;  %vm272_vm2 = vcmp.lt.s32.totalorder %v1539_v3, 112  ;;  %vm257_vm4 = vcmp.lt.s32.totalorder %v1539_v3, 100  ;;  %1195 = vmatprep.subr.mxu0 %v1478_v2  ;;  %1229 = vmatpush3.msra.mxu1 %v465_v16  ;;  %v367_v20 = vld [vmem:[#allocation32 + $0x48] sm:$0xff]  ;;  %v462_v21 = vld [vmem:[#allocation32 + $0xe0] sm:$0xff]  ;;  %v461_v23 = vld [vmem:[#allocation32 + $0xd8] sm:$0xff] }
  0x14   :  { %1196 = vmatpush3.msra.mxu0 %v372_v10  ;;  %1230 = vmatprep.subr.mxu1 %v1478_v2  ;;  %v366_v22 = vld [vmem:[#allocation32 + $0x40] sm:$0xff]  ;;  %v365_v24 = vld [vmem:[#allocation32 + $0x38] sm:$0xff]  ;;  %v460_v25 = vld [vmem:[#allocation32 + $0xd0] sm:$0xff]  ;;  %vm280_vm5 = vcmp.lt.s32.totalorder %v1539_v3, 16  ;;  %vm323_vm7 = vcmp.lt.s32.totalorder %v1539_v3, 96  ;;  %vm312_vm9 = vcmp.lt.s32.totalorder %v1539_v3, 64 }
  0x15   :  { %vm268_vm1 = vcmp.lt.s32.totalorder %v1542_v4, 140  ;;  %vm253_vm3 = vcmp.lt.s32.totalorder %v1542_v4, 228  ;;  %1197 = vmatprep.subr.mxu0 %v1478_v2  ;;  %1231 = vmatpush3.msra.mxu1 %v464_v17  ;;  %v364_v26 = vld [vmem:[#allocation32 + $0x30] sm:$0xff]  ;;  %v459_v27 = vld [vmem:[#allocation32 + $0xc8] sm:$0xff]  ;;  %v458_v29 = vld [vmem:[#allocation32 + $0xc0] sm:$0xff]  ;;  %vm319_vm6 = vcmp.lt.s32.totalorder %v1542_v4, 160 }
  0x16   :  { %v269_v8 = vsel %vm268_vm1, %v264_v5, %v1532_v0  ;;  %v254_v9 = vsel %vm253_vm3, %v249_v6, %v1532_v0  ;;  %1198 = vmatpush3.msra.mxu0 %v371_v12  ;;  %1232 = vmatprep.subr.mxu1 %v1478_v2  ;;  %v363_v28 = vld [vmem:[#allocation32 + $0x28] sm:$0xff]  ;;  %v362_v30 = vld [vmem:[#allocation32 + $0x20] sm:$0xff]  ;;  %v457_v31 = vld [vmem:[#allocation32 + $0xb8] sm:$0xff]  ;;  %vm308_vm8 = vcmp.lt.s32.totalorder %v1542_v4, 192  ;;  %vm330_vm10 = vcmp.lt.s32.totalorder %v1539_v3, 32 }
  0x17   :  { %v273_v11 = vsel %vm272_vm2, %v269_v8, %v1532_v0  ;;  %v258_v13 = vsel %vm257_vm4, %v254_v9, %v1532_v0  ;;  %1199 = vmatprep.subr.mxu0 %v1478_v2  ;;  %1233 = vmatpush3.msra.mxu1 %v463_v19  ;;  %v361_v32 = vld [vmem:[#allocation32 + $0x18] sm:$0xff]  ;;  %v456_v33 = vld [vmem:[#allocation32 + $0xb0] sm:$0xff]  ;;  %v455_v35 = vld [vmem:[#allocation32 + $0xa8] sm:$0xff] }
  0x18   :  { %274 = vrot.lane.b32.xlu0 %v273_v11, %s1480_s16  ;;  %1200 = vmatpush3.msra.mxu0 %v370_v14  ;;  %v360_v34 = vld [vmem:[#allocation32 + $0x10] sm:$0xff]  ;;  %v359_v36 = vld [vmem:[#allocation32 + $0x8] sm:$0xff]  ;;  %v454_v37 = vld [vmem:[#allocation32 + $0xa0] sm:$0xff] }
  0x19   :  { %1201 = vmatprep.subr.mxu0 %v1478_v2  ;;  %1234 = vmatprep.subr.mxu1 %v1478_v2  ;;  %v358_v38 = vld [vmem:[#allocation32] sm:$0xff]  ;;  %v453_v39 = vld [vmem:[#allocation32 + $0x98] sm:$0xff]  ;;  %v452_v47 = vld [vmem:[#allocation32 + $0x90] sm:$0xff] }
  0x1a   :  { %1202 = vmatpush3.msra.mxu0 %v369_v15  ;;  %1235 = vmatpush3.msra.mxu1 %v462_v21  ;;  %v276_v40 = vld [vmem:[%s1735_s7] sm:$0xff]  ;;  %v451_v48 = vld [vmem:[#allocation32 + $0x88] sm:$0xff]  ;;  %v557_v50 = vld [vmem:[#allocation32 + $0x178] sm:$0xff] }
  0x1b   :  { %1203 = vmatprep.subr.mxu0 %v1478_v2  ;;  %1236 = vmatprep.subr.mxu1 %v1478_v2  ;;  %v281_v41 = vsel %vm280_vm5, %v276_v40, %v1532_v0  ;;  %v450_v49 = vld [vmem:[#allocation32 + $0x80] sm:$0xff]  ;;  %v556_v51 = vld [vmem:[#allocation32 + $0x170] sm:$0xff]  ;;  %v555_v52 = vld [vmem:[#allocation32 + $0x168] sm:$0xff] }
  0x1c   :  { %259 = vrot.lane.b32.xlu0 %v258_v13, %s1481_s5  ;;  %1204 = vmatpush3.msra.mxu0 %v368_v18  ;;  %v554_v53 = vld [vmem:[#allocation32 + $0x160] sm:$0xff]  ;;  %v553_v54 = vld [vmem:[#allocation32 + $0x158] sm:$0xff]  ;;  %v552_v55 = vld [vmem:[#allocation32 + $0x150] sm:$0xff] }
  0x1d   :  { %1205 = vmatprep.subr.mxu0 %v1478_v2  ;;  %1237 = vmatpush3.msra.mxu1 %v461_v23  ;;  %v551_v56 = vld [vmem:[#allocation32 + $0x148] sm:$0xff]  ;;  %v550_v57 = vld [vmem:[#allocation32 + $0x140] sm:$0xff]  ;;  %v549_v58 = vld [vmem:[#allocation32 + $0x138] sm:$0xff] }
  0x1e   :  { %1206 = vmatpush3.msra.mxu0 %v367_v20  ;;  %1238 = vmatprep.subr.mxu1 %v1478_v2  ;;  %v548_v59 = vld [vmem:[#allocation32 + $0x130] sm:$0xff]  ;;  %v547_v60 = vld [vmem:[#allocation32 + $0x128] sm:$0xff]  ;;  %v546_v61 = vld [vmem:[#allocation32 + $0x120] sm:$0xff] }
  0x1f   :  { %1207 = vmatprep.subr.mxu0 %v1478_v2  ;;  %1239 = vmatpush3.msra.mxu1 %v460_v25  ;;  %v545_v62 = vld [vmem:[#allocation32 + $0x118] sm:$0xff]  ;;  %v1066_v63 = vld [vmem:[#allocation32 + $0x380] ss:$0 sm:$0xff]  ;;  %v544_v8 = vld [vmem:[#allocation32 + $0x110] sm:$0xff] }
  0x20   :  { %1208 = vmatpush3.msra.mxu0 %v366_v22  ;;  %1240 = vmatprep.subr.mxu1 %v1478_v2  ;;  %v543_v9 = vld [vmem:[#allocation32 + $0x108] sm:$0xff]  ;;  %v542_v10 = vld [vmem:[#allocation32 + $0x100] sm:$0xff]  ;;  %v648_v11 = vld [vmem:[#allocation32 + $0x1f8] sm:$0xff] }
  0x21   :  { %1209 = vmatprep.subr.mxu0 %v1478_v2  ;;  %1241 = vmatpush3.msra.mxu1 %v459_v27  ;;  %v647_v12 = vld [vmem:[#allocation32 + $0x1f0] sm:$0xff]  ;;  %v646_v13 = vld [vmem:[#allocation32 + $0x1e8] sm:$0xff]  ;;  %v645_v14 = vld [vmem:[#allocation32 + $0x1e0] sm:$0xff] }
  0x22   :  { %1210 = vmatpush3.msra.mxu0 %v365_v24  ;;  %1242 = vmatprep.subr.mxu1 %v1478_v2  ;;  %v644_v15 = vld [vmem:[#allocation32 + $0x1d8] sm:$0xff]  ;;  %v643_v16 = vld [vmem:[#allocation32 + $0x1d0] sm:$0xff]  ;;  %v642_v17 = vld [vmem:[#allocation32 + $0x1c8] sm:$0xff] }
  0x23   :  { %1211 = vmatprep.subr.mxu0 %v1478_v2  ;;  %1243 = vmatpush3.msra.mxu1 %v458_v29  ;;  %v641_v18 = vld [vmem:[#allocation32 + $0x1c0] sm:$0xff]  ;;  %v640_v19 = vld [vmem:[#allocation32 + $0x1b8] sm:$0xff]  ;;  %v639_v20 = vld [vmem:[#allocation32 + $0x1b0] sm:$0xff] }
  0x24   :  { %1212 = vmatpush3.msra.mxu0 %v364_v26  ;;  %1244 = vmatprep.subr.mxu1 %v1478_v2  ;;  %v638_v21 = vld [vmem:[#allocation32 + $0x1a8] sm:$0xff]  ;;  %v637_v22 = vld [vmem:[#allocation32 + $0x1a0] sm:$0xff]  ;;  %v636_v23 = vld [vmem:[#allocation32 + $0x198] sm:$0xff] }
  0x25   :  { %1213 = vmatprep.subr.mxu0 %v1478_v2  ;;  %1245 = vmatpush3.msra.mxu1 %v457_v31  ;;  %v635_v24 = vld [vmem:[#allocation32 + $0x190] sm:$0xff]  ;;  %v1067_v25 = vld [vmem:[#allocation32 + $0x381] ss:$0 sm:$0xff] }
  0x26   :  { %1214 = vmatpush3.msra.mxu0 %v363_v28  ;;  %1246 = vmatprep.subr.mxu1 %v1478_v2  ;;  %v633_v31 = vld [vmem:[#allocation32 + $0x180] sm:$0xff] }
  0x27   :  { %1215 = vmatprep.subr.mxu0 %v1478_v2  ;;  %1247 = vmatpush3.msra.mxu1 %v456_v33  ;;  %v235_v33 = vld [vmem:[%s1729_s1] sm:$0xff]  ;;  %s1483_s1 = smov 64  }
  0x28   :  { %1216 = vmatpush3.msra.mxu0 %v362_v30  ;;  %1248 = vmatprep.subr.mxu1 %v1478_v2  ;;  %v634_v30 = vld [vmem:[#allocation32 + $0x188] sm:$0xff]  ;;  %v747_v40 = vld [vmem:[#allocation32 + $0x260] sm:$0xff] }
  0x29   :  { %1217 = vmatprep.subr.mxu0 %v1478_v2  ;;  %1249 = vmatpush3.msra.mxu1 %v455_v35  ;;  %v309_v35 = vsel %vm308_vm8, %v235_v33, %v1532_v0  ;;  %v946_v33 = vld [vmem:[#allocation32 + $0x378] sm:$0xff] }
  0x2a   :  { %1218 = vmatpush3.msra.mxu0 %v361_v32  ;;  %1250 = vmatprep.subr.mxu1 %v1478_v2  ;;  %v241_v32 = vld [vmem:[%s1731_s3] sm:$0xff]  ;;  %s1482_s3 = smov 32   ;;  %v313_v4 = vsel %vm312_vm9, %v309_v35, %v1532_v0  ;;  %v944_v35 = vld [vmem:[#allocation32 + $0x368] sm:$0xff] }
  0x2b   :  { %1219 = vmatprep.subr.mxu0 %v1478_v2  ;;  %1251 = vmatpush3.msra.mxu1 %v454_v37  ;;  %v749_v37 = vld [vmem:[#allocation32 + $0x270] sm:$0xff] }
  0x2c   :  { %1220 = vmatpush3.msra.mxu0 %v360_v34  ;;  %1252 = vmatprep.subr.mxu1 %v1478_v2  ;;  %v320_v34 = vsel %vm319_vm6, %v241_v32, %v1532_v0  ;;  %v839_v32 = vld [vmem:[#allocation32 + $0x280] sm:$0xff] }
  0x2d   :  { %1221 = vmatprep.subr.mxu0 %v1478_v2  ;;  %1253 = vmatpush3.msra.mxu1 %v453_v39  ;;  %v748_v39 = vld [vmem:[#allocation32 + $0x268] sm:$0xff] }
  0x2e   :  { %1222 = vmatpush3.msra.mxu0 %v359_v36  ;;  %1254 = vmatprep.subr.mxu1 %v1478_v2  ;;  %v750_v36 = vld [vmem:[#allocation32 + $0x278] sm:$0xff] }
  0x2f   :  { %1223 = vmatprep.subr.mxu0 %v1478_v2  ;;  %1255 = vmatpush3.msra.mxu1 %v452_v47 }
  0x30   :  { %1224 = vmatpush3.msra.mxu0 %v358_v38  ;;  %1256 = vmatprep.subr.mxu1 %v1478_v2  ;;  %v324_v38 = vsel %vm323_vm7, %v320_v34, %v1532_v0  ;;  %v945_v34 = vld [vmem:[#allocation32 + $0x370] sm:$0xff] }
  0x31   :  { %1263 = vmatprep.subr.mxu0 %v1478_v2  ;;  %1257 = vmatpush3.msra.mxu1 %v451_v48 }
  0x32   :  { %1258 = vmatprep.subr.mxu1 %v1478_v2  ;;  %325 = vrot.lane.b32.xlu1 %v324_v38, %s1482_s3  ;;  %v941_v38 = vld [vmem:[#allocation32 + $0x350] sm:$0xff] }
  0x33   :  { %1259 = vmatpush3.msra.mxu1 %v450_v49  ;;  %v742_v49 = vld [vmem:[#allocation32 + $0x238] sm:$0xff] }
  0x34   :  { %1298 = vmatprep.subr.mxu1 %v1478_v2 }
  0x36   :  { %314 = vrot.lane.b32.xlu1 %v313_v4, %s1483_s1  ;;  %v939_v4 = vld [vmem:[#allocation32 + $0x340] sm:$0xff] }
  0x8a   :  { %v275_v42 = vpop.permute.xlu0 %274 }
  0x8b   :  { %v284_v43 = vmax.f32 %v281_v41, %v275_v42  ;;  %v746_v41 = vld [vmem:[#allocation32 + $0x258] sm:$0xff]  ;;  %v745_v42 = vld [vmem:[#allocation32 + $0x250] sm:$0xff] }
  0x8e   :  { %v260_v44 = vpop.permute.xlu0 %259 }
  0x8f   :  { %v288_v45 = vmax.f32 %v284_v43, %v260_v44  ;;  %v744_v43 = vld [vmem:[#allocation32 + $0x248] sm:$0xff]  ;;  %v743_v44 = vld [vmem:[#allocation32 + $0x240] sm:$0xff] }
  0x91   :  { %v300_v46 = vmax.f32 %v288_v45, %v1532_v0  ;;  %v1068_v45 = vld [vmem:[#allocation32 + $0x382] ss:$0 sm:$0xff] }
  0x93   :  { %1226 = vmatmul.mubr.f32.vlgmr.msra.gmra.mxu0 %v300_v46 }
  0x94   :  { %1295 = vmatprep.mubr.msk.f32.mxu0 %vm1479_vm0, %v1478_v2  ;;  %1264 = vmatpush3.msra.mxu0 %v557_v50  ;;  %v741_v50 = vld [vmem:[#allocation32 + $0x230] sm:$0xff] }
  0x95   :  { %1265 = vmatprep.subr.mxu0 %v1478_v2 }
  0x96   :  { %1266 = vmatpush3.msra.mxu0 %v556_v51  ;;  %v740_v51 = vld [vmem:[#allocation32 + $0x228] sm:$0xff] }
  0x97   :  { %1267 = vmatprep.subr.mxu0 %v1478_v2 }
  0x98   :  { %1268 = vmatpush3.msra.mxu0 %v555_v52  ;;  %v739_v52 = vld [vmem:[#allocation32 + $0x220] sm:$0xff] }
  0x99   :  { %1269 = vmatprep.subr.mxu0 %v1478_v2 }
  0x9a   :  { %1270 = vmatpush3.msra.mxu0 %v554_v53  ;;  %v738_v53 = vld [vmem:[#allocation32 + $0x218] sm:$0xff] }
  0x9b   :  { %1271 = vmatprep.subr.mxu0 %v1478_v2 }
  0x9c   :  { %1272 = vmatpush3.msra.mxu0 %v553_v54  ;;  %v737_v54 = vld [vmem:[#allocation32 + $0x210] sm:$0xff] }
  0x9d   :  { %1273 = vmatprep.subr.mxu0 %v1478_v2 }
  0x9e   :  { %1274 = vmatpush3.msra.mxu0 %v552_v55  ;;  %v736_v55 = vld [vmem:[#allocation32 + $0x208] sm:$0xff] }
  0x9f   :  { %1275 = vmatprep.subr.mxu0 %v1478_v2 }
  0xa0   :  { %1276 = vmatpush3.msra.mxu0 %v551_v56  ;;  %v735_v56 = vld [vmem:[#allocation32 + $0x200] sm:$0xff] }
  0xa1   :  { %1277 = vmatprep.subr.mxu0 %v1478_v2 }
  0xa2   :  { %1278 = vmatpush3.msra.mxu0 %v550_v57  ;;  %v245_v57 = vld [vmem:[%s1732_s4] sm:$0xff] }
  0xa3   :  { %1279 = vmatprep.subr.mxu0 %v1478_v2 }
  0xa4   :  { %1280 = vmatpush3.msra.mxu0 %v549_v58  ;;  %v326_v58 = vpop.permute.xlu1 %325 }
  0xa5   :  { %1281 = vmatprep.subr.mxu0 %v1478_v2 }
  0xa6   :  { %1282 = vmatpush3.msra.mxu0 %v548_v59  ;;  %v331_v59 = vsel %vm330_vm10, %v245_v57, %v1532_v0  ;;  %v933_v57 = vld [vmem:[#allocation32 + $0x310] sm:$0xff] }
  0xa7   :  { %1283 = vmatprep.subr.mxu0 %v1478_v2 }
  0xa8   :  { %1284 = vmatpush3.msra.mxu0 %v547_v60  ;;  %v342_v60 = vmax.f32 %v331_v59, %v326_v58  ;;  %v932_v58 = vld [vmem:[#allocation32 + $0x308] sm:$0xff]  ;;  %v931_v59 = vld [vmem:[#allocation32 + $0x300] sm:$0xff] }
  0xa9   :  { %1285 = vmatprep.subr.mxu0 %v1478_v2 }
  0xaa   :  { %1286 = vmatpush3.msra.mxu0 %v546_v61  ;;  %v315_v61 = vpop.permute.xlu1 %314 }
  0xab   :  { %1287 = vmatprep.subr.mxu0 %v1478_v2 }
  0xac   :  { %1288 = vmatpush3.msra.mxu0 %v545_v62  ;;  %v1069_v62 = vld [vmem:[#allocation32 + $0x383] ss:$0 sm:$0xff] }
  0xad   :  { %1289 = vmatprep.subr.mxu0 %v1478_v2 }
  0xae   :  { %1290 = vmatpush3.msra.mxu0 %v544_v8 }
  0xaf   :  { %1291 = vmatprep.subr.mxu0 %v1478_v2 }
  0xb0   :  { %1292 = vmatpush3.msra.mxu0 %v543_v9 }
  0xb1   :  { %1293 = vmatprep.subr.mxu0 %v1478_v2 }
  0xb2   :  { %1294 = vmatpush3.msra.mxu0 %v542_v10 }
  0xb3   :  { %1333 = vmatprep.subr.mxu0 %v1478_v2 }
 0x153   :  { %v445_v1 = vpop.f32.mrf.mxu0 }
 0x154   :  { %v446_v5 = vadd.f32 %v1066_v63, %v445_v1  ;;  %v346_v63 = vmax.f32 %v342_v60, %v315_v61  ;;  %v1072_v60 = vld [vmem:[#allocation32 + $0x385] ss:$0 sm:$0xff] }
 0x155   :  { %v1227_v6 = vpop.f32.mrf.mxu0 }
 0x156   :  { %v449_v7 = vmax.f32 %v446_v5, 0.0 }
 0x158   :  { %1261 = vmatmul.mubr.f32.vlgmr.msra.gmra.mxu1 %v449_v7  ;;  %v350_v7 = vmax.f32 %v1532_v0, %v346_v63 }
 0x159   :  { %1330 = vmatprep.mubr.msk.f32.mxu1 %vm1479_vm0, %v1478_v2  ;;  %1299 = vmatpush3.msra.mxu1 %v648_v11  ;;  %v1070_v11 = vld [vmem:[#allocation32 + $0x387] ss:$0 sm:$0xff] }
 0x15a   :  { %1300 = vmatprep.subr.mxu1 %v1478_v2 }
 0x15b   :  { %1301 = vmatpush3.msra.mxu1 %v647_v12 }
 0x15c   :  { %1302 = vmatprep.subr.mxu1 %v1478_v2 }
 0x15d   :  { %1303 = vmatpush3.msra.mxu1 %v646_v13 }
 0x15e   :  { %1304 = vmatprep.subr.mxu1 %v1478_v2 }
 0x15f   :  { %1305 = vmatpush3.msra.mxu1 %v645_v14  ;;  %v1071_v14 = vld [vmem:[#allocation32 + $0x384] ss:$0 sm:$0xff] }
 0x160   :  { %1306 = vmatprep.subr.mxu1 %v1478_v2 }
 0x161   :  { %1307 = vmatpush3.msra.mxu1 %v644_v15  ;;  %v854_v15 = vld [vmem:[#allocation32 + $0x2f8] sm:$0xff] }
 0x162   :  { %1308 = vmatprep.subr.mxu1 %v1478_v2 }
 0x163   :  { %1309 = vmatpush3.msra.mxu1 %v643_v16 }
 0x164   :  { %1310 = vmatprep.subr.mxu1 %v1478_v2 }
 0x165   :  { %1311 = vmatpush3.msra.mxu1 %v642_v17  ;;  %v853_v17 = vld [vmem:[#allocation32 + $0x2f0] sm:$0xff] }
 0x166   :  { %1312 = vmatprep.subr.mxu1 %v1478_v2 }
 0x167   :  { %1313 = vmatpush3.msra.mxu1 %v641_v18 }
 0x168   :  { %1314 = vmatprep.subr.mxu1 %v1478_v2 }
 0x169   :  { %1315 = vmatpush3.msra.mxu1 %v640_v19  ;;  %v852_v19 = vld [vmem:[#allocation32 + $0x2e8] sm:$0xff] }
 0x16a   :  { %1316 = vmatprep.subr.mxu1 %v1478_v2 }
 0x16b   :  { %1317 = vmatpush3.msra.mxu1 %v639_v20  ;;  %v851_v20 = vld [vmem:[#allocation32 + $0x2e0] sm:$0xff] }
 0x16c   :  { %1318 = vmatprep.subr.mxu1 %v1478_v2 }
 0x16d   :  { %1319 = vmatpush3.msra.mxu1 %v638_v21  ;;  %v850_v21 = vld [vmem:[#allocation32 + $0x2d8] sm:$0xff] }
 0x16e   :  { %1320 = vmatprep.subr.mxu1 %v1478_v2 }
 0x16f   :  { %1321 = vmatpush3.msra.mxu1 %v637_v22  ;;  %v849_v22 = vld [vmem:[#allocation32 + $0x2d0] sm:$0xff] }
 0x170   :  { %1322 = vmatprep.subr.mxu1 %v1478_v2 }
 0x171   :  { %1323 = vmatpush3.msra.mxu1 %v636_v23  ;;  %v848_v23 = vld [vmem:[#allocation32 + $0x2c8] sm:$0xff] }
 0x172   :  { %1324 = vmatprep.subr.mxu1 %v1478_v2 }
 0x173   :  { %1325 = vmatpush3.msra.mxu1 %v635_v24  ;;  %v847_v24 = vld [vmem:[#allocation32 + $0x2c0] sm:$0xff] }
 0x174   :  { %1326 = vmatprep.subr.mxu1 %v1478_v2 }
 0x175   :  { %1327 = vmatpush3.msra.mxu1 %v634_v30  ;;  %v841_v30 = vld [vmem:[#allocation32 + $0x290] sm:$0xff] }
 0x176   :  { %1328 = vmatprep.subr.mxu1 %v1478_v2 }
 0x177   :  { %1329 = vmatpush3.msra.mxu1 %v633_v31  ;;  %v840_v31 = vld [vmem:[#allocation32 + $0x288] sm:$0xff] }
 0x178   :  { %1368 = vmatprep.subr.mxu1 %v1478_v2 }
 0x218   :  { %v537_v26 = vpop.f32.mrf.mxu1 }
 0x219   :  { %v538_v27 = vadd.f32 %v1067_v25, %v537_v26  ;;  %v846_v25 = vld [vmem:[#allocation32 + $0x2b8] sm:$0xff]  ;;  %v845_v26 = vld [vmem:[#allocation32 + $0x2b0] sm:$0xff] }
 0x21a   :  { %v1262_v28 = vpop.f32.mrf.mxu1 }
 0x21b   :  { %v541_v29 = vmax.f32 %v538_v27, 0.0  ;;  %v844_v27 = vld [vmem:[#allocation32 + $0x2a8] sm:$0xff]  ;;  %v843_v28 = vld [vmem:[#allocation32 + $0x2a0] sm:$0xff] }
 0x21d   :  { %1296 = vmatmul.mubr.f32.vlgmr.msra.gmra.mxu0 %v541_v29  ;;  %v842_v29 = vld [vmem:[#allocation32 + $0x298] sm:$0xff] }
 0x21e   :  { %1365 = vmatprep.mubr.msk.f32.mxu0 %vm1479_vm0, %v1478_v2  ;;  %1334 = vmatpush3.msra.mxu0 %v750_v36  ;;  %v943_v36 = vld [vmem:[#allocation32 + $0x360] sm:$0xff] }
 0x21f   :  { %1335 = vmatprep.subr.mxu0 %v1478_v2 }
 0x220   :  { %1336 = vmatpush3.msra.mxu0 %v749_v37  ;;  %v942_v37 = vld [vmem:[#allocation32 + $0x358] sm:$0xff] }
 0x221   :  { %1337 = vmatprep.subr.mxu0 %v1478_v2 }
 0x222   :  { %1338 = vmatpush3.msra.mxu0 %v748_v39  ;;  %v940_v39 = vld [vmem:[#allocation32 + $0x348] sm:$0xff] }
 0x223   :  { %1339 = vmatprep.subr.mxu0 %v1478_v2 }
 0x224   :  { %1340 = vmatpush3.msra.mxu0 %v747_v40  ;;  %v938_v40 = vld [vmem:[#allocation32 + $0x338] sm:$0xff] }
 0x225   :  { %1341 = vmatprep.subr.mxu0 %v1478_v2 }
 0x226   :  { %1342 = vmatpush3.msra.mxu0 %v746_v41  ;;  %v937_v41 = vld [vmem:[#allocation32 + $0x330] sm:$0xff] }
 0x227   :  { %1343 = vmatprep.subr.mxu0 %v1478_v2 }
 0x228   :  { %1344 = vmatpush3.msra.mxu0 %v745_v42  ;;  %v936_v42 = vld [vmem:[#allocation32 + $0x328] sm:$0xff] }
 0x229   :  { %1345 = vmatprep.subr.mxu0 %v1478_v2 }
 0x22a   :  { %1346 = vmatpush3.msra.mxu0 %v744_v43  ;;  %v935_v43 = vld [vmem:[#allocation32 + $0x320] sm:$0xff] }
 0x22b   :  { %1347 = vmatprep.subr.mxu0 %v1478_v2 }
 0x22c   :  { %1348 = vmatpush3.msra.mxu0 %v743_v44  ;;  %v934_v44 = vld [vmem:[#allocation32 + $0x318] sm:$0xff] }
 0x22d   :  { %1349 = vmatprep.subr.mxu0 %v1478_v2 }
 0x22e   :  { %1350 = vmatpush3.msra.mxu0 %v742_v49 }
 0x22f   :  { %1351 = vmatprep.subr.mxu0 %v1478_v2 }
 0x230   :  { %1352 = vmatpush3.msra.mxu0 %v741_v50 }
 0x231   :  { %1353 = vmatprep.subr.mxu0 %v1478_v2 }
 0x232   :  { %1354 = vmatpush3.msra.mxu0 %v740_v51 }
 0x233   :  { %1355 = vmatprep.subr.mxu0 %v1478_v2 }
 0x234   :  { %1356 = vmatpush3.msra.mxu0 %v739_v52 }
 0x235   :  { %1357 = vmatprep.subr.mxu0 %v1478_v2 }
 0x236   :  { %1358 = vmatpush3.msra.mxu0 %v738_v53 }
 0x237   :  { %1359 = vmatprep.subr.mxu0 %v1478_v2 }
 0x238   :  { %1360 = vmatpush3.msra.mxu0 %v737_v54 }
 0x239   :  { %1361 = vmatprep.subr.mxu0 %v1478_v2 }
 0x23a   :  { %1362 = vmatpush3.msra.mxu0 %v736_v55 }
 0x23b   :  { %1363 = vmatprep.subr.mxu0 %v1478_v2 }
 0x23c   :  { %1364 = vmatpush3.msra.mxu0 %v735_v56 }
 0x23d   :  { %1403 = vmatprep.subr.mxu0 %v1478_v2 }
 0x2dd   :  { %v629_v46 = vpop.f32.mrf.mxu0 }
 0x2de   :  { %v630_v47 = vadd.f32 %v1068_v45, %v629_v46 }
 0x2df   :  { %v1297_v48 = vpop.f32.mrf.mxu0 }
 0x2e0   :  { %1022 = vst [vmem:[%s1736_s8] sm:$0xff] %v630_v47  ;;  %1331 = vmatmul.mubr.f32.vlgmr.msra.gmra.mxu1 %v630_v47 }
 0x2e1   :  { %1400 = vmatprep.mubr.msk.f32.mxu1 %vm1479_vm0, %v1478_v2  ;;  %1369 = vmatpush3.msra.mxu1 %v854_v15 }
 0x2e2   :  { %1370 = vmatprep.subr.mxu1 %v1478_v2 }
 0x2e3   :  { %1371 = vmatpush3.msra.mxu1 %v853_v17 }
 0x2e4   :  { %1372 = vmatprep.subr.mxu1 %v1478_v2 }
 0x2e5   :  { %1373 = vmatpush3.msra.mxu1 %v852_v19 }
 0x2e6   :  { %1374 = vmatprep.subr.mxu1 %v1478_v2 }
 0x2e7   :  { %1375 = vmatpush3.msra.mxu1 %v851_v20 }
 0x2e8   :  { %1376 = vmatprep.subr.mxu1 %v1478_v2 }
 0x2e9   :  { %1377 = vmatpush3.msra.mxu1 %v850_v21 }
 0x2ea   :  { %1378 = vmatprep.subr.mxu1 %v1478_v2 }
 0x2eb   :  { %1379 = vmatpush3.msra.mxu1 %v849_v22 }
 0x2ec   :  { %1380 = vmatprep.subr.mxu1 %v1478_v2 }
 0x2ed   :  { %1381 = vmatpush3.msra.mxu1 %v848_v23 }
 0x2ee   :  { %1382 = vmatprep.subr.mxu1 %v1478_v2 }
 0x2ef   :  { %1383 = vmatpush3.msra.mxu1 %v847_v24 }
 0x2f0   :  { %1384 = vmatprep.subr.mxu1 %v1478_v2 }
 0x2f1   :  { %1385 = vmatpush3.msra.mxu1 %v846_v25 }
 0x2f2   :  { %1386 = vmatprep.subr.mxu1 %v1478_v2 }
 0x2f3   :  { %1387 = vmatpush3.msra.mxu1 %v845_v26 }
 0x2f4   :  { %1388 = vmatprep.subr.mxu1 %v1478_v2 }
 0x2f5   :  { %1389 = vmatpush3.msra.mxu1 %v844_v27 }
 0x2f6   :  { %1390 = vmatprep.subr.mxu1 %v1478_v2 }
 0x2f7   :  { %1391 = vmatpush3.msra.mxu1 %v843_v28 }
 0x2f8   :  { %1392 = vmatprep.subr.mxu1 %v1478_v2 }
 0x2f9   :  { %1393 = vmatpush3.msra.mxu1 %v842_v29 }
 0x2fa   :  { %1394 = vmatprep.subr.mxu1 %v1478_v2 }
 0x2fb   :  { %1395 = vmatpush3.msra.mxu1 %v841_v30 }
 0x2fc   :  { %1396 = vmatprep.subr.mxu1 %v1478_v2 }
 0x2fd   :  { %1397 = vmatpush3.msra.mxu1 %v840_v31 }
 0x2fe   :  { %1398 = vmatprep.subr.mxu1 %v1478_v2 }
 0x2ff   :  { %1399 = vmatpush3.msra.mxu1 %v839_v32 }
 0x3a0   :  { %v720_v1 = vpop.f32.mrf.mxu1 }
 0x3a1   :  { %v721_v5 = vadd.f32 %v1069_v62, %v720_v1 }
 0x3a2   :  { %v1332_v6 = vpop.f32.mrf.mxu1 }
 0x3a3   :  { %v724_v8 = vsub.f32 %v721_v5, %v630_v47  ;;  %v1073_v5 = vld [vmem:[#allocation32 + $0x386] ss:$0 sm:$0xff] }
 0x3a5   :  { %v725_v9 = vmul.f32 %v724_v8, %v350_v7 }
 0x3a7   :  { %v726_v10 = vadd.f32 %v725_v9, %v630_v47 }
 0x3a9   :  { %v728_v12 = vsub.f32 %v630_v47, %v726_v10  ;;  %1023 = vst [vmem:[%s1736_s8 + $0x8] sm:$0xff] %v726_v10 }
 0x3ab   :  { %v733_v3 = vmul.f32 %v1070_v11, %v728_v12 }
 0x3ad   :  { %v1683_v13 = vadd.f32 %v733_v3, %v726_v10 }
 0x3af   :  { %1366 = vmatmul.mubr.f32.vlgmr.msra.gmra.mxu0 %v1683_v13 }
 0x3b0   :  { %1435 = vmatprep.mubr.msk.f32.mxu0 %vm1479_vm0, %v1478_v2  ;;  %1404 = vmatpush3.msra.mxu0 %v946_v33 }
 0x3b1   :  { %1405 = vmatprep.subr.mxu0 %v1478_v2 }
 0x3b2   :  { %1406 = vmatpush3.msra.mxu0 %v945_v34 }
 0x3b3   :  { %1407 = vmatprep.subr.mxu0 %v1478_v2 }
 0x3b4   :  { %1408 = vmatpush3.msra.mxu0 %v944_v35 }
 0x3b5   :  { %1409 = vmatprep.subr.mxu0 %v1478_v2 }
 0x3b6   :  { %1410 = vmatpush3.msra.mxu0 %v943_v36 }
 0x3b7   :  { %1411 = vmatprep.subr.mxu0 %v1478_v2 }
 0x3b8   :  { %1412 = vmatpush3.msra.mxu0 %v942_v37 }
 0x3b9   :  { %1413 = vmatprep.subr.mxu0 %v1478_v2 }
 0x3ba   :  { %1414 = vmatpush3.msra.mxu0 %v941_v38 }
 0x3bb   :  { %1415 = vmatprep.subr.mxu0 %v1478_v2 }
 0x3bc   :  { %1416 = vmatpush3.msra.mxu0 %v940_v39 }
 0x3bd   :  { %1417 = vmatprep.subr.mxu0 %v1478_v2 }
 0x3be   :  { %1418 = vmatpush3.msra.mxu0 %v939_v4 }
 0x3bf   :  { %1419 = vmatprep.subr.mxu0 %v1478_v2 }
 0x3c0   :  { %1420 = vmatpush3.msra.mxu0 %v938_v40 }
 0x3c1   :  { %1421 = vmatprep.subr.mxu0 %v1478_v2 }
 0x3c2   :  { %1422 = vmatpush3.msra.mxu0 %v937_v41 }
 0x3c3   :  { %1423 = vmatprep.subr.mxu0 %v1478_v2 }
 0x3c4   :  { %1424 = vmatpush3.msra.mxu0 %v936_v42 }
 0x3c5   :  { %1425 = vmatprep.subr.mxu0 %v1478_v2 }
 0x3c6   :  { %1426 = vmatpush3.msra.mxu0 %v935_v43 }
 0x3c7   :  { %1427 = vmatprep.subr.mxu0 %v1478_v2 }
 0x3c8   :  { %1428 = vmatpush3.msra.mxu0 %v934_v44 }
 0x3c9   :  { %1429 = vmatprep.subr.mxu0 %v1478_v2 }
 0x3ca   :  { %1430 = vmatpush3.msra.mxu0 %v933_v57 }
 0x3cb   :  { %1431 = vmatprep.subr.mxu0 %v1478_v2 }
 0x3cc   :  { %1432 = vmatpush3.msra.mxu0 %v932_v58 }
 0x3cd   :  { %1433 = vmatprep.subr.mxu0 %v1478_v2 }
 0x3ce   :  { %1434 = vmatpush3.msra.mxu0 %v931_v59 }
 0x46f   :  { %v822_v0 = vpop.f32.mrf.mxu0 }
 0x470   :  { %v1688_v16 = vadd.f32 %v1071_v14, %v822_v0 }
 0x471   :  { %v1367_v18 = vpop.f32.mrf.mxu0 }
 0x472   :  { %826 = vrot.lane.b32.xlu0 %v1688_v16, %s1483_s1 }
 0x4e4   :  { %v827_v45 = vpop.permute.xlu0 %826 }
 0x4e5   :  { %v828_v46 = vmax.f32 %v1688_v16, %v827_v45 }
 0x4e7   :  { %v829_v47 = vsub.f32 %v1688_v16, %v828_v46  ;;  %v832_v48 = vsub.f32 %v827_v45, %v828_v46 }
 0x4e9   :  { %v830_v49 = vmul.f32 1.442695, %v829_v47  ;;  %v833_v50 = vmul.f32 1.442695, %v832_v48 }
 0x4eb   :  { %1447 = vpow2.f32 %v830_v49 }
 0x4ec   :  { %1449 = vpow2.f32 %v833_v50 }
 0x4f8   :  { %v1448_v51 = vpop.eup %1447 }
 0x4f9   :  { %v1450_v52 = vpop.eup %1449 }
 0x4fa   :  { %v835_v53 = vadd.f32 %v1450_v52, %v1448_v51 }
 0x4fc   :  { %1451 = vrcp.f32 %v835_v53 }
 0x509   :  { %v1452_v54 = vpop.eup %1451 }
 0x50a   :  { %v837_v55 = vmul.f32 %v1452_v54, %v1448_v51 }
 0x50c   :  { %v838_v56 = vmul.f32 %v837_v55, %v1683_v13 }
 0x50e   :  { %1401 = vmatmul.mubr.f32.vlgmr.msra.gmra.mxu1 %v838_v56 }
 0x5ce   :  { %v926_v61 = vpop.f32.mrf.mxu1 }
 0x5cf   :  { %v927_v62 = vadd.f32 %v1072_v60, %v926_v61 }
 0x5d0   :  { %v1402_v63 = vpop.f32.mrf.mxu1 }
 0x5d1   :  { %v930_v1 = vmax.f32 %v927_v62, 0.0 }
 0x5d3   :  { %1436 = vmatmul.mubr.f32.vlgmr.msra.gmra.mxu0 %v930_v1 }
 0x693   :  { %v1018_v6 = vpop.f32.mrf.mxu0 }
 0x694   :  { %v1019_v7 = vadd.f32 %v1073_v5, %v1018_v6 }
 0x695   :  { %v1437_v8 = vpop.f32.mrf.mxu0 }
 0x696   :  { %1024 = vst [vmem:[%s1736_s8 + $0x10] sm:$0xff] %v1019_v7 }
 0x697   :  { %1029 = vsyncpa [#allocation33], 1 }

</bundles_post_ra>
